<compile_context>
chip_gen: v7x
topology: tpu7x:2x2x1
jax: 0.10.0
libtpu: 0.0.40
codegen_flags: <defaults>
</compile_context>

<pallas_src>
import jax
import jax.numpy as jnp
from jax.experimental import pallas as pl
from jax.experimental.pallas import tpu as pltpu


def _ceil_to(x, m):
    return ((x + m - 1) // m) * m


# ----------------------------------------------------------------------------
# Kernels
# ----------------------------------------------------------------------------
def _make_dense_dot_kernel(precision):
    """Lane-dense path: out = x(TB, window*dy) @ banded_w(window*dy, dy) + b."""

    def kernel(w2_ref, b_ref, x_ref, o_ref):
        # w2_ref: (window*dy, dy) VMEM banded weight, resident across steps
        # b_ref : (1,)            SMEM bias scalar
        # x_ref : (TB, window*dy) VMEM lane-dense input rows
        # o_ref : (TB, dy)        VMEM output block
        acc = jnp.dot(
            x_ref[...],
            w2_ref[...],
            preferred_element_type=jnp.float32,
            precision=precision,
        )
        o_ref[...] = (acc + b_ref[0]).astype(o_ref.dtype)

    return kernel


def _wide_kernel(w_ref, b_ref, x_ref, o_ref):
    """Wide path (dy >= 128): VPU multiply + sublane reduce, f32 accumulation.

    The (TB, window, dy) f32 product transient is accounted for in the TB
    budget chosen by the wrapper, so it cannot blow the VMEM limit.
    """
    # w_ref: (window, 1) VMEM, resident; b_ref: (1,) SMEM;
    # x_ref: (TB, window, dy); o_ref: (TB, dy)
    x = x_ref[...].astype(jnp.float32)
    w = w_ref[...].astype(jnp.float32)
    acc = jnp.sum(x * w[None, :, :], axis=1)
    o_ref[...] = (acc + b_ref[0]).astype(o_ref.dtype)


# ----------------------------------------------------------------------------
# Batch-tile (TB) selection
# ----------------------------------------------------------------------------
def _pick_tb(batch, per_row_bytes, reserved_bytes, vmem_limit, per_buffer_cap,
             max_tb):
    usable = min(max(vmem_limit - reserved_bytes, per_row_bytes),
                 2 * per_buffer_cap)
    tb = int(max(1, usable // per_row_bytes))
    tb = min(tb, batch)
    if batch >= 16:
        # Keep >= 2 grid steps so the 'parallel' axis can shard across the two
        # TensorCores of a v7x chip (harmless on 1-TC v5e/v6e).
        tb = min(tb, _ceil_to((batch + 1) // 2, 8))
    if max_tb is not None:
        tb = min(tb, int(max_tb))
    if tb < batch:
        # Partial-batch blocks must stay sublane (8-row) aligned.
        tb = min(batch, max(8, (tb // 8) * 8))
    # TODO(synk): if even a single row exceeds the budget (huge window*dy), add
    # an 'arbitrary' reduction grid axis over the window with an f32 scratch.
    return tb


# ----------------------------------------------------------------------------
# Wrapper
# ----------------------------------------------------------------------------
def linear_model_forward(y_c, weight, bias, window, *, max_tb=None):
    """Pallas forward of spacetimeformer LinearModel.

    y_c: (batch, length, dy); weight: (1, window) or (window,); bias: (1,).
    Returns (batch, 1, dy), same as the PyTorch module.
    """
    batch, length, dy = y_c.shape
    assert 1 <= window <= length
    off = length - window
    dtype = y_c.dtype
    itemsize = jnp.dtype(dtype).itemsize
    sub_mult = 8 * max(1, 4 // itemsize)  # sublane packing: f32 8, bf16 16, i8 32

    wvec = jnp.asarray(weight).reshape(window)
    bias1 = jnp.asarray(bias, dtype=jnp.float32).reshape(1)  # SMEM scalar

    # ---- chip-aware VMEM budget --------------------------------------------
    try:
        vmem_cap = int(pltpu.get_tpu_info().vmem_capacity_bytes)
    except Exception:  # conservative default (v7x-sized VMEM)
        vmem_cap = 64 * 2 ** 20
    vmem_limit = int(min((vmem_cap * 3) // 4, 96 * 2 ** 20))  # v7x ~48M, v5e/v6e ~96M
    per_buffer_cap = 16 * 2 ** 20 if vmem_cap <= 72 * 2 ** 20 else 28 * 2 ** 20
    headroom = 4 * 2 ** 20

    wd = window * dy
    banded_w_bytes = _ceil_to(wd, sub_mult) * _ceil_to(dy, 128) * itemsize
    use_dense = (dy < 128) and (banded_w_bytes <= 4 * 2 ** 20)

    compiler_params = pltpu.CompilerParams(
        dimension_semantics=("parallel",),
        vmem_limit_bytes=vmem_limit,
    )

    if use_dense:
        # ---- lane-dense layout: (batch, length*dy), blocks (TB, window*dy) --
        if off == 0 or (off % window == 0 and wd % 128 == 0):
            # Free reshape; the window offset is folded into the column block
            # index, so y_c is read from HBM exactly once, with no slice pass.
            x2d = y_c.reshape(batch, length * dy)
            col_block = off // window
        else:
            # One-time slice of the last `window` steps (~3x window*dy bytes of
            # HBM traffic) instead of streaming the full length axis.
            x2d = y_c[:, off:, :].reshape(batch, wd)
            col_block = 0

        # Banded weight: w2[t*dy + i, j] = w[t] * (i == j), so x2d @ w2 gives
        # out[b, d] = sum_t w[t] * x[b, t*dy + d] on the MXU.
        eye = jnp.eye(dy, dtype=dtype)
        w2 = (wvec.astype(dtype).reshape(window, 1, 1) * eye[None, :, :]
              ).reshape(wd, dy)

        row_in = _ceil_to(wd, 128) * itemsize   # lane-padded VMEM input row
        row_out = _ceil_to(dy, 128) * itemsize
        per_row = 2 * row_in + 2 * row_out      # double-buffered in + out
        tb = _pick_tb(batch, per_row, banded_w_bytes + headroom,
                      vmem_limit, per_buffer_cap, max_tb)
        grid = (pl.cdiv(batch, tb),)

        def build(precision):
            return pl.pallas_call(
                _make_dense_dot_kernel(precision),
                out_shape=jax.ShapeDtypeStruct((batch, dy), dtype),
                grid_spec=pltpu.PrefetchScalarGridSpec(
                    num_scalar_prefetch=0,
                    grid=grid,
                    in_specs=[
                        # banded weight: constant index_map -> resident in VMEM
                        pl.BlockSpec((wd, dy), lambda b: (0, 0)),
                        # bias: scalar in SMEM
                        pl.BlockSpec(memory_space=pltpu.MemorySpace.SMEM),
                        # lane-dense input rows (offset folded into col block)
                        pl.BlockSpec((tb, wd), lambda b, c=col_block: (b, c)),
                    ],
                    out_specs=pl.BlockSpec((tb, dy), lambda b: (b, 0)),
                ),
                compiler_params=compiler_params,
            )

        try:
            # HIGHEST keeps the MXU contraction in full f32.
            out2d = build(jax.lax.Precision.HIGHEST)(w2, bias1, x2d)
        except Exception:
            # Some Mosaic versions reject the precision hint on tpu.matmul;
            # fall back to the default contraction (accumulation is f32 anyway
            # and the kernel is HBM-bound, so this is a precision-only change).
            out2d = build(None)(w2, bias1, x2d)

    else:
        # ---- wide layout (dy >= 128, or oversized banded weight) ------------
        if off == 0 or (off % window == 0 and window % 8 == 0):
            x3 = y_c                         # offset folded into the index_map
            len_block = off // window
        else:
            x3 = y_c[:, off:, :]             # one-time slice, never full-length
            len_block = 0
        w_col = wvec.astype(dtype).reshape(window, 1)

        dy_pad = _ceil_to(dy, 128)
        row_in = _ceil_to(window, sub_mult) * dy_pad * itemsize
        row_out = dy_pad * itemsize
        transient = _ceil_to(window, 8) * dy_pad * 4   # f32 product transient
        per_row = 2 * row_in + 2 * row_out + transient
        reserved = _ceil_to(window, sub_mult) * 128 * itemsize + headroom
        tb = _pick_tb(batch, per_row, reserved, vmem_limit, per_buffer_cap,
                      max_tb)
        grid = (pl.cdiv(batch, tb),)

        out2d = pl.pallas_call(
            _wide_kernel,
            out_shape=jax.ShapeDtypeStruct((batch, dy), dtype),
            grid_spec=pltpu.PrefetchScalarGridSpec(
                num_scalar_prefetch=0,
                grid=grid,
                in_specs=[
                    # weight column: constant index_map -> resident in VMEM
                    pl.BlockSpec((window, 1), lambda b: (0, 0)),
                    # bias: scalar in SMEM
                    pl.BlockSpec(memory_space=pltpu.MemorySpace.SMEM),
                    # context rows; length offset folded into the block index
                    pl.BlockSpec((tb, window, dy),
                                 lambda b, l=len_block: (b, l, 0)),
                ],
                out_specs=pl.BlockSpec((tb, dy), lambda b: (b, 0)),
            ),
            compiler_params=compiler_params,
        )(w_col, bias1, x3)

    # Add the size-1 "length" dim back outside the kernel (free reshape).
    return out2d[:, None, :]


# ----------------------------------------------------------------------------
# Reference + tests
# ----------------------------------------------------------------------------
def _reference(y_c, weight, bias, window):
    w = jnp.asarray(weight).reshape(-1).astype(jnp.float32)
    b = jnp.asarray(bias, jnp.float32).reshape(())
    x = y_c[:, -window:, :].astype(jnp.float32)
    out = jnp.sum(x * w[None, :, None], axis=1) + b
    return out[:, None, :].astype(y_c.dtype)


def _run_case(key, batch, length, dy, window, max_tb=None):
    k_x, k_w, k_b = jax.random.split(key, 3)
    y_c = jax.random.normal(k_x, (batch, length, dy), dtype=jnp.float32)
    bound = 1.0 / (window ** 0.5)
    weight = jax.random.uniform(k_w, (1, window), jnp.float32, -bound, bound)
    bias = jax.random.uniform(k_b, (1,), jnp.float32, -bound, bound)

    out = jax.block_until_ready(
        linear_model_forward(y_c, weight, bias, window, max_tb=max_tb))
    ref = _reference(y_c, weight, bias, window)
    assert out.shape == (batch, 1, dy), out.shape
    # Tolerance covers every MXU f32 contraction mode on all generations.
    err = float(jnp.max(jnp.abs(out.astype(jnp.float32) - ref.astype(jnp.float32))))
    assert jnp.allclose(out, ref, atol=5e-3, rtol=5e-3), err


if __name__ == "__main__":
    key = jax.random.PRNGKey(0)
    keys = jax.random.split(key, 5)
    # Primary small case (module defaults): window == length, dy << 128.
    _run_case(keys[0], batch=2, length=8, dy=4, window=8)
    # Window-aligned offset folded into the index_map (lane-dense, no copy).
    _run_case(keys[1], batch=4, length=24, dy=16, window=8)
    # Unalignable offset -> one-time host-side slice path (no full-length stream).
    _run_case(keys[2], batch=4, length=24, dy=4, window=8)
    # Wide path (dy >= 128): offset folded into the length-axis block index.
    _run_case(keys[3], batch=2, length=16, dy=128, window=8)
    # Partial trailing batch block (batch % TB != 0) is masked correctly.
    _run_case(keys[4], batch=10, length=8, dy=4, window=8, max_tb=8)
    print("KERNEL_OK")
</pallas_src>

<mosaic_0001>
module attributes {stable_mosaic.version = 11 : i64} {
  func.func @kernel(%arg0: i32, %arg1: memref<32x4xf32, #tpu.memory_space<vmem>>, %arg2: memref<1xf32, #tpu.memory_space<smem>>, %arg3: memref<2x32xf32, #tpu.memory_space<vmem>>, %arg4: memref<2x4xf32, #tpu.memory_space<vmem>>) attributes {dimension_semantics = [#tpu.dimension_semantics<parallel>], iteration_bounds = array<i64: 1>, scalar_prefetch = 0 : i64, scratch_operands = 0 : i64, tpu.core_type = #tpu.core_type<tc>, window_params = [{pipeline_mode = #tpu.pipeline_mode<synchronous>, transform_indices = @transform_0, window_bounds = array<i64: 32, 4>}, {transform_indices = @transform_1, window_bounds = array<i64: 1>}, {transform_indices = @transform_2, window_bounds = array<i64: 2, 32>}, {transform_indices = @transform_3, window_bounds = array<i64: 2, 4>}]} {
    %c0 = arith.constant 0 : index
    %c0_0 = arith.constant 0 : index
    %0 = vector.load %arg3[%c0, %c0_0] : memref<2x32xf32, #tpu.memory_space<vmem>>, vector<2x32xf32>
    %c0_1 = arith.constant 0 : index
    %c0_2 = arith.constant 0 : index
    %1 = vector.load %arg1[%c0_1, %c0_2] : memref<32x4xf32, #tpu.memory_space<vmem>>, vector<32x4xf32>
    %cst = arith.constant dense<0.000000e+00> : vector<2x4xf32>
    %2 = tpu.matmul %0, %1, %cst {dimension_numbers = #tpu.dot_dimension_numbers<[1], [0], [0], [1], [0, 0, 1, 1], [], []>, precision = #tpu.contract_precision<fp32>} : vector<2x32xf32>, vector<32x4xf32>, vector<2x4xf32> -> vector<2x4xf32>
    %c0_3 = arith.constant 0 : index
    %3 = memref.load %arg2[%c0_3] : memref<1xf32, #tpu.memory_space<smem>>
    %4 = vector.broadcast %3 : f32 to vector<2x4xf32>
    %5 = arith.addf %2, %4 : vector<2x4xf32>
    %c0_4 = arith.constant 0 : index
    %c0_5 = arith.constant 0 : index
    %6 = vector.load %arg4[%c0_4, %c0_5] : memref<2x4xf32, #tpu.memory_space<vmem>>, vector<2x4xf32>
    tpu.vector_store %arg4[%c0_4, %c0_5], %5 {strides = array<i32>} : memref<2x4xf32, #tpu.memory_space<vmem>>, vector<2x4xf32>,
    return
  }
  func.func @transform_0(%arg0: i32) -> (i32, i32) {
    %c0_i32 = arith.constant 0 : i32
    %c0_i32_0 = arith.constant 0 : i32
    %c0_i32_1 = arith.constant 0 : i32
    return %c0_i32, %c0_i32_0 : i32, i32
  }
  func.func @transform_1(%arg0: i32) -> i32 {
    %c0_i32 = arith.constant 0 : i32
    %c0_i32_0 = arith.constant 0 : i32
    return %c0_i32 : i32
  }
  func.func @transform_2(%arg0: i32) -> (i32, i32) {
    %c0_i32 = arith.constant 0 : i32
    %c0_i32_0 = arith.constant 0 : i32
    return %arg0, %c0_i32 : i32, i32
  }
  func.func @transform_3(%arg0: i32) -> (i32, i32) {
    %c0_i32 = arith.constant 0 : i32
    %c0_i32_0 = arith.constant 0 : i32
    return %arg0, %c0_i32 : i32, i32
  }
}

module attributes {stable_mosaic.version = 11 : i64} {
  func.func @kernel(%arg0: i32, %arg1: memref<32x4xf32, #tpu.memory_space<vmem>>, %arg2: memref<1xf32, #tpu.memory_space<smem>>, %arg3: memref<2x32xf32, #tpu.memory_space<vmem>>, %arg4: memref<2x4xf32, #tpu.memory_space<vmem>>) attributes {dimension_semantics = [#tpu.dimension_semantics<parallel>], iteration_bounds = array<i64: 1>, scalar_prefetch = 0 : i64, scratch_operands = 0 : i64, tpu.core_type = #tpu.core_type<tc>, window_params = [{pipeline_mode = #tpu.pipeline_mode<synchronous>, transform_indices = @transform_0, window_bounds = array<i64: 32, 4>}, {transform_indices = @transform_1, window_bounds = array<i64: 1>}, {transform_indices = @transform_2, window_bounds = array<i64: 2, 32>}, {transform_indices = @transform_3, window_bounds = array<i64: 2, 4>}]} {
    %c0 = arith.constant 0 : index
    %c0_0 = arith.constant 0 : index
    %0 = vector.load %arg3[%c0, %c0_0] : memref<2x32xf32, #tpu.memory_space<vmem>>, vector<2x32xf32>
    %c0_1 = arith.constant 0 : index
    %c0_2 = arith.constant 0 : index
    %1 = vector.load %arg1[%c0_1, %c0_2] : memref<32x4xf32, #tpu.memory_space<vmem>>, vector<32x4xf32>
    %cst = arith.constant dense<0.000000e+00> : vector<2x4xf32>
    %2 = tpu.matmul %0, %1, %cst {dimension_numbers = #tpu.dot_dimension_numbers<[1], [0], [0], [1], [0, 0, 1, 1], [], []>} : vector<2x32xf32>, vector<32x4xf32>, vector<2x4xf32> -> vector<2x4xf32>
    %c0_3 = arith.constant 0 : index
    %3 = memref.load %arg2[%c0_3] : memref<1xf32, #tpu.memory_space<smem>>
    %4 = vector.broadcast %3 : f32 to vector<2x4xf32>
    %5 = arith.addf %2, %4 : vector<2x4xf32>
    %c0_4 = arith.constant 0 : index
    %c0_5 = arith.constant 0 : index
    %6 = vector.load %arg4[%c0_4, %c0_5] : memref<2x4xf32, #tpu.memory_space<vmem>>, vector<2x4xf32>
    tpu.vector_store %arg4[%c0_4, %c0_5], %5 {strides = array<i32>} : memref<2x4xf32, #tpu.memory_space<vmem>>, vector<2x4xf32>,
    return
  }
  func.func @transform_0(%arg0: i32) -> (i32, i32) {
    %c0_i32 = arith.constant 0 : i32
    %c0_i32_0 = arith.constant 0 : i32
    %c0_i32_1 = arith.constant 0 : i32
    return %c0_i32, %c0_i32_0 : i32, i32
  }
  func.func @transform_1(%arg0: i32) -> i32 {
    %c0_i32 = arith.constant 0 : i32
    %c0_i32_0 = arith.constant 0 : i32
    return %c0_i32 : i32
  }
  func.func @transform_2(%arg0: i32) -> (i32, i32) {
    %c0_i32 = arith.constant 0 : i32
    %c0_i32_0 = arith.constant 0 : i32
    return %arg0, %c0_i32 : i32, i32
  }
  func.func @transform_3(%arg0: i32) -> (i32, i32) {
    %c0_i32 = arith.constant 0 : i32
    %c0_i32_0 = arith.constant 0 : i32
    return %arg0, %c0_i32 : i32, i32
  }
}

</mosaic_0001>

<bundles_post_ra>
// kernel: tpu_custom_call.1
= control target key start
LH: loop header
LB: loop body
LE: loop exit
PB: predicated region body
PF: predicated region fallthrough
CT: control target
= control target key end

     0   :  { %v698_v3 = vmov 0.0|0.0   ;;  %vm699_vm0 = vmmov 0   ;;  %v700_v10 = vmov 0.0   ;;  %vm23_vm1 = vcmask 261120   ;;  %s770_s0 = inlined_call_operand.vmem [shape: f32[32,4], index: 0, kind: input, shape index: {}]   ;;  %s771_s1 = inlined_call_operand.<no memory space> [shape: f32[1], index: 1, kind: input, shape index: {}]   ;;  %s772_s2 = inlined_call_operand.vmem [shape: f32[2,32], index: 2, kind: input, shape index: {}]   ;;  %s773_s3 = inlined_call_operand.hbm [shape: f32[2,4], index: 3, kind: output, shape index: {}]  }
   0x1   :  { %v17_v0 = vld [vmem:[%s770_s0] sm:$0xff]  ;;  %v18_v1 = vld [vmem:[%s770_s0 + $0x8] sm:$0xff]  ;;  %v19_v2 = vld [vmem:[%s770_s0 + $0x10] sm:$0xff]  ;;  %624 = vmatprep.subr.bf16.mxu1 %v698_v3  ;;  %642 = vmatprep.subr.bf16.mxu0 %v698_v3 }
   0x2   :  { %v28_v4 = vand.u32 4294901760, %v17_v0  ;;  %v31_v5 = vand.u32 4294901760, %v18_v1  ;;  %v20_v6 = vld [vmem:[%s770_s0 + $0x18] sm:$0xff]  ;;  %v34_v7 = vand.u32 4294901760, %v19_v2  ;;  %v16_v8 = vld [vmem:[%s772_s2] sm:$0x3]  ;;  %566 = vmatprep.mubr.msk.f32.mxu1 %vm699_vm0, %v700_v10  ;;  %599 = vmatprep.mubr.msk.f32.mxu0 %vm699_vm0, %v700_v10 }
   0x3   :  { %v37_v9 = vand.u32 4294901760, %v20_v6 }
   0x4   :  { %9 = vsyncpa [#allocation4], 0  ;;  %v625_v11 = vpack.c.bf16 %v31_v5, %v28_v4  ;;  %v108_v12 = vsub.f32 %v17_v0, %v28_v4  ;;  %v115_v13 = vsub.f32 %v18_v1, %v31_v5  ;;  %v122_v14 = vsub.f32 %v19_v2, %v34_v7  ;;  %s701_s22 = smov [#allocation3]  }
   0x5   :  { %v628_v15 = vpack.c.bf16 %v37_v9, %v34_v7  ;;  %v129_v16 = vsub.f32 %v20_v6, %v37_v9  ;;  %v25_v17 = vsel %vm23_vm1, %v16_v8, 0  ;;  %v22_v42 = vstv %s771_s1  ;;  %s520_s23 = sshll.u32 %s701_s22, 4  ;;  %s521_s23 = int_to_ptr.vmem [resolvable:$true] %s520_s23 }
   0x6   :  { %626 = vmatpush3.bf16.msra.mxu1 %v625_v11  ;;  %644 = vmatpush3.bf16.msra.mxu0 %v625_v11  ;;  %v96_v18 = vand.u32 4294901760, %v25_v17  ;;  %v109_v19 = vand.u32 4294901760, %v108_v12  ;;  %v116_v20 = vand.u32 4294901760, %v115_v13  ;;  %v123_v21 = vand.u32 4294901760, %v122_v14  ;;  %s674_s24 = scalar_lea.vmem %s521_s23, 32  ;;  %p679_p1 = scmp.lt.s32.totalorder %s521_s23, %s521_s23 }
   0x7   :  { %627 = vmatprep.subr.bf16.mxu1 %v698_v3  ;;  %645 = vmatprep.subr.bf16.mxu0 %v698_v3  ;;  %v130_v22 = vand.u32 4294901760, %v129_v16  ;;  %v637_v39 = vpack.c.bf16 %v115_v13, %v108_v12  ;;  %v640_v40 = vpack.c.bf16 %v129_v16, %v122_v14  ;;  %vm512_vm2 = vcmask 25600   ;;  %p675_p0 = scmp.ne.s32.totalorder %s521_s23, %s674_s24  ;;  %p680_p2 = scmp.lt.s32.totalorder %s674_s24, %s674_s24 }
   0x8   :  { %v97_v23 = vsub.f32 %v25_v17, %v96_v18  ;;  %v110_v24 = vsub.f32 %v108_v12, %v109_v19  ;;  %v117_v25 = vsub.f32 %v115_v13, %v116_v20  ;;  %v124_v26 = vsub.f32 %v122_v14, %v123_v21 }
   0x9   :  { %v131_v27 = vsub.f32 %v129_v16, %v130_v22  ;;  %v649_v31 = vpack.c.bf16 %v116_v20, %v109_v19  ;;  %v652_v37 = vpack.c.bf16 %v130_v22, %v123_v21  ;;  %p681_p3 = por %p680_p2, %p679_p1 }
   0xa   :  { %629 = vmatpush3.bf16.msra.mxu1 %v628_v15  ;;  %647 = vmatpush3.bf16.msra.mxu0 %v628_v15  ;;  %v98_v28 = vand.u32 4294901760, %v97_v23  ;;  %v111_v29 = vand.u32 4294901760, %v110_v24  ;;  %v118_v30 = vand.u32 4294901760, %v117_v25  ;;  %v125_v34 = vand.u32 4294901760, %v124_v26 }
   0xb   :  { %630 = vmatprep.subr.bf16.mxu1 %v698_v3  ;;  %648 = vmatprep.subr.bf16.mxu0 %v698_v3  ;;  %v132_v35 = vand.u32 4294901760, %v131_v27  ;;  %p682_p4 = pnand %p681_p3, %p675_p0 }
   0xc   :  { %v99_v32 = vsub.f32 %v97_v23, %v98_v28  ;;  %v631_v33 = vpack.c.bf16 %v118_v30, %v111_v29 }
   0xd   :  { %600 = vmatmul.mubr.f32.vlgmr.msra.gmra.mrb[0].mxu0 %v98_v28  ;;  %v634_v38 = vpack.c.bf16 %v132_v35, %v125_v34 }
   0xe   :  { %v100_v36 = vand.u32 4294901760, %v99_v32  ;;  %650 = vmatpush3.bf16.msra.mxu0 %v649_v31  ;;  %610 = vmatprep.mubr.msk.f32.mxu0 %vm699_vm0, %v700_v10 }
   0xf   :  { %651 = vmatprep.subr.bf16.mxu0 %v698_v3 }
  0x10   :  { %567 = vmatmul.mubr.f32.vlgmr.msra.gmra.mrb[0].mxu1 %v100_v36 }
  0x11   :  { %632 = vmatpush3.bf16.msra.mxu1 %v631_v33  ;;  %577 = vmatprep.mubr.msk.f32.mxu1 %vm699_vm0, %v700_v10 }
  0x12   :  { %633 = vmatprep.subr.bf16.mxu1 %v698_v3  ;;  %653 = vmatpush3.bf16.msra.mxu0 %v652_v37 }
  0x13   :  { %654 = vmatprep.subr.bf16.mxu0 %v698_v3 }
  0x15   :  { %635 = vmatpush3.bf16.msra.mxu1 %v634_v38  ;;  %611 = vmatmul.mubr.f32.vlgmr.msra.gmra.mrb[0].mxu0 %v96_v18 }
  0x16   :  { %636 = vmatprep.subr.bf16.mxu1 %v698_v3  ;;  %656 = vmatpush3.bf16.msra.mxu0 %v625_v11 }
  0x17   :  { %657 = vmatprep.subr.bf16.mxu0 %v698_v3  ;;  %621 = vmatprep.mubr.msk.f32.mxu0 %vm699_vm0, %v700_v10 }
  0x18   :  { %578 = vmatmul.mubr.f32.vlgmr.msra.gmra.mrb[0].mxu1 %v96_v18 }
  0x19   :  { %638 = vmatpush3.bf16.msra.mxu1 %v637_v39  ;;  %588 = vmatprep.mubr.msk.f32.mxu1 %vm699_vm0, %v700_v10 }
  0x1a   :  { %639 = vmatprep.subr.bf16.mxu1 %v698_v3  ;;  %659 = vmatpush3.bf16.msra.mxu0 %v628_v15 }
  0x1d   :  { %641 = vmatpush3.bf16.msra.mxu1 %v640_v40  ;;  %622 = vmatmul.mubr.f32.vlgmr.msra.gmra.mrb[0].mxu0 %v96_v18 }
  0x20   :  { %589 = vmatmul.mubr.f32.vlgmr.msra.gmra.mrb[0].mxu1 %v97_v23 }
  0xf0   :  { %v508_v41 = vpop.f32.mrb[0].mxu0 }
  0xf1   :  { %v623_v43 = vpop.f32.mrb[1].mxu0 }
  0xf3   :  { %v273_v44 = vpop.f32.mrb[0].mxu1 }
  0xf4   :  { %v660_v45 = vadd.f32 %v273_v44, %v22_v42  ;;  %v590_v46 = vpop.f32.mrb[1].mxu1 }
  0xf6   :  { %v661_v47 = vadd.f32 %v660_v45, %v508_v41 }
  0xf8   :  { %513 = vst.msk [vmem:[#allocation3] sm:$0x3] %vm512_vm2, %v661_v47 }
  0xf9   :  { %685 = shalt.err (!%p682_p4)
}
  0xfa   :  { %s686_s1 = scalar_lea.hbm %s773_s3, 32 }
  0xfb   :  { %p687_p5 = scmp.ne.s32.totalorder %s773_s3, %s686_s1  ;;  %p690_p6 = scmp.lt.u32.totalorder %s686_s1, %s773_s3 }
  0xfd   :  { %p692_p7 = pnand %p690_p6, %p687_p5 }
  0xff   :  { %695 = shalt.err (!%p692_p7)
}
 0x100   :  { %523 = dma.vmem_to_hbm [thread:$0]  %s521_s23, 32, %s773_s3, [#allocation4]  }
 0x101   :  { %696 = dma.done.wait [#allocation4], 32  }
 0x102   :  { %697 = vsyncadd [#allocation4], 4294967264 }
 0x103   :  { %527 = vsyncpa [#allocation4], 1 }

// kernel: tpu_custom_call.1
= control target key start
LH: loop header
LB: loop body
LE: loop exit
PB: predicated region body
PF: predicated region fallthrough
CT: control target
= control target key end

     0   :  { %v164_v3 = vmov 0.0|0.0   ;;  %vm165_vm0 = vmmov 0   ;;  %v166_v6 = vmov 0.0   ;;  %s218_s0 = inlined_call_operand.vmem [shape: f32[32,4], index: 0, kind: input, shape index: {}]   ;;  %s219_s1 = inlined_call_operand.<no memory space> [shape: f32[1], index: 1, kind: input, shape index: {}]   ;;  %s220_s2 = inlined_call_operand.vmem [shape: f32[2,32], index: 2, kind: input, shape index: {}]   ;;  %s221_s3 = inlined_call_operand.hbm [shape: f32[2,4], index: 3, kind: output, shape index: {}]  }
   0x1   :  { %v17_v0 = vld [vmem:[%s218_s0] sm:$0xff]  ;;  %v18_v1 = vld [vmem:[%s218_s0 + $0x8] sm:$0xff]  ;;  %v19_v2 = vld [vmem:[%s218_s0 + $0x10] sm:$0xff]  ;;  %130 = vmatprep.subr.bf16.mxu0 %v164_v3  ;;  %127 = vmatprep.mubr.msk.f32.mxu0 %vm165_vm0, %v166_v6 }
   0x2   :  { %v131_v4 = vpack.c.bf16 %v18_v1, %v17_v0  ;;  %v20_v5 = vld [vmem:[%s218_s0 + $0x18] sm:$0xff] }
   0x3   :  { %9 = vsyncpa [#allocation4], 0  ;;  %v134_v7 = vpack.c.bf16 %v20_v5, %v19_v2  ;;  %v16_v8 = vld [vmem:[%s220_s2] sm:$0x3]  ;;  %vm23_vm1 = vcmask 261120   ;;  %v22_v9 = vstv %s219_s1  ;;  %s167_s24 = smov [#allocation3]  }
   0x4   :  { %132 = vmatpush3.bf16.msra.mxu0 %v131_v4  ;;  %s105_s0 = sshll.u32 %s167_s24, 4  ;;  %vm97_vm2 = vcmask 25600   ;;  %s106_s0 = int_to_ptr.vmem [resolvable:$true] %s105_s0 }
   0x5   :  { %133 = vmatprep.subr.bf16.mxu0 %v164_v3  ;;  %s140_s25 = scalar_lea.vmem %s106_s0, 32  ;;  %p145_p1 = scmp.lt.s32.totalorder %s106_s0, %s106_s0 }
   0x6   :  { %p141_p0 = scmp.ne.s32.totalorder %s106_s0, %s140_s25  ;;  %p146_p2 = scmp.lt.s32.totalorder %s140_s25, %s140_s25 }
   0x8   :  { %135 = vmatpush3.bf16.msra.mxu0 %v134_v7  ;;  %p147_p3 = por %p146_p2, %p145_p1 }
   0xa   :  { %p148_p4 = pnand %p147_p3, %p141_p0 }
   0xb   :  { %128 = vmatmul.mubr.msk.f32.vlgmr.msra.gmra.mrb[0].mxu0 %vm23_vm1, %v16_v8 }
  0xde   :  { %v93_v10 = vpop.f32.mrb[0].mxu0 }
  0xdf   :  { %v94_v11 = vadd.f32 %v93_v10, %v22_v9  ;;  %v129_v12 = vpop.f32.mrb[1].mxu0 }
  0xe1   :  { %98 = vst.msk [vmem:[#allocation3] sm:$0x3] %vm97_vm2, %v94_v11 }
  0xe2   :  { %151 = shalt.err (!%p148_p4)
}
  0xe3   :  { %s152_s27 = scalar_lea.hbm %s221_s3, 32 }
  0xe4   :  { %p153_p5 = scmp.ne.s32.totalorder %s221_s3, %s152_s27  ;;  %p156_p6 = scmp.lt.u32.totalorder %s152_s27, %s221_s3 }
  0xe6   :  { %p158_p7 = pnand %p156_p6, %p153_p5 }
  0xe8   :  { %161 = shalt.err (!%p158_p7)
}
  0xe9   :  { %108 = dma.vmem_to_hbm [thread:$0]  %s106_s0, 32, %s221_s3, [#allocation4]  }
  0xea   :  { %162 = dma.done.wait [#allocation4], 32  }
  0xeb   :  { %163 = vsyncadd [#allocation4], 4294967264 }
  0xec   :  { %112 = vsyncpa [#allocation4], 1 }

</bundles_post_ra>
